<compile_context>
chip_gen: v7x
topology: tpu7x:2x2x1
jax: 0.10.0
libtpu: 0.0.40
codegen_flags: <defaults>
</compile_context>

<pallas_src>
import functools

import numpy as np

import jax
import jax.numpy as jnp
from jax.experimental import pallas as pl
from jax.experimental.pallas import tpu as pltpu


def _build_constants(num_heads, head_dim):
    """Constant 0/1 matrices (built on host, passed as kernel inputs)."""
    H, hd = num_heads, head_dim
    E = H * hd          # embed_dim
    HE = H * E          # width of the expanded q/k slabs
    scale = 1.0 / (hd ** 0.5)

    r_e = np.arange(E)
    c_he = np.arange(HE)
    same_d = (c_he[None, :] % hd) == (r_e[:, None] % hd)
    # q_expanded[:, (qi*H+ki)*hd + d] = q[:, qi*hd + d]
    eq = (((c_he[None, :] // hd) // H) == (r_e[:, None] // hd)) & same_d
    # k_expanded[:, (qi*H+ki)*hd + d] = k[:, ki*hd + d]
    ek = (((c_he[None, :] // hd) % H) == (r_e[:, None] // hd)) & same_d
    # v_tiled[:, qi*hd + d] = sum_vi v[:, vi*hd + d]   (sum heads, tile H times)
    m_sum_tile = (r_e[None, :] % hd) == (r_e[:, None] % hd)               # (E, E)
    # pool: sum each hd-lane group -> per-(qi,ki) score column (scale folded in)
    pool = ((np.arange(HE)[:, None] // hd) == (np.arange(H * H)[None, :]))
    pool = pool.astype(np.float32) * scale                                # (HE, H*H)
    # g: sum over ki within each qi group
    g = (np.arange(H * H)[:, None] // H) == (np.arange(H)[None, :])       # (H*H, H)
    # e_head: broadcast per-qi scalar across that head's hd lanes
    e_head = (np.arange(E)[None, :] // hd) == (np.arange(H)[:, None])     # (H, E)

    f32 = lambda a: jnp.asarray(a, jnp.float32)
    return f32(eq), f32(ek), f32(m_sum_tile), f32(pool), f32(g), f32(g.T), f32(e_head)


def mha_kernel(h_ref, wqkv_ref, bqkv_ref, pool_ref, g_ref, gt_ref, eh_ref,
               wo_ref, bo_ref, o_ref, *, num_heads, head_dim):
    H = num_heads
    hd = head_dim
    E = H * hd
    HE = H * E

    h = h_ref[...]

    # One fused MXU matmul: expanded-Q | expanded-K | head-summed-tiled-V.
    qkv = jnp.dot(h, wqkv_ref[...], preferred_element_type=jnp.float32) + bqkv_ref[...]
    q_exp = qkv[:, 0:HE]                  # (N, H*E), lane-aligned slice
    k_exp = qkv[:, HE:2 * HE]             # (N, H*E)
    v_tiled = qkv[:, 2 * HE:2 * HE + E]   # (N, E) = tile(sum_v V, H)

    # All H*H head scores at once: elementwise product + 0/1 pooling matmul
    # (1/sqrt(hd) already folded into pool_ref).
    s = jnp.dot(q_exp * k_exp, pool_ref[...],
                preferred_element_type=jnp.float32)                 # (N, H*H)

    # Vectorized softmax over ki within each qi group.  Subtracting the
    # per-row max (a constant within every group) is equivalent to the
    # per-group max subtraction done by jax.nn.softmax.
    m = jnp.max(s, axis=-1, keepdims=True)
    p = jnp.exp(s - m)                                              # (N, H*H)
    denom = jnp.dot(p, g_ref[...], preferred_element_type=jnp.float32)   # (N, H)
    # approx=False: exact reciprocal keeps us well inside the 1e-4 tolerance.
    inv_denom = pl.reciprocal(denom, approx=False)
    attn = p * jnp.dot(inv_denom, gt_ref[...],
                       preferred_element_type=jnp.float32)          # (N, H*H)
    # Degenerate contraction 'nqk,nvd->nqd': (sum_k attn) * (sum_v V).
    a_sum = jnp.dot(attn, g_ref[...], preferred_element_type=jnp.float32)  # (N, H)
    attended = jnp.dot(a_sum, eh_ref[...],
                       preferred_element_type=jnp.float32) * v_tiled       # (N, E)

    # Single output projection matmul.
    o_ref[...] = (jnp.dot(attended, wo_ref[...],
                          preferred_element_type=jnp.float32) + bo_ref[...])


def multi_head_attention(h, params, *, num_heads, head_dim, tile_n=None):
    n, input_dim = h.shape
    E = num_heads * head_dim

    eq, ek, m_sum_tile, pool, g, gt, e_head = _build_constants(num_heads, head_dim)

    # Fold the per-head expansion / head-sum / tiling into the fused QKV weight.
    w_fused = jnp.concatenate(
        [params["wq"] @ eq, params["wk"] @ ek, params["wv"] @ m_sum_tile], axis=1)
    b_fused = jnp.concatenate(
        [params["bq"] @ eq, params["bk"] @ ek, params["bv"] @ m_sum_tile], axis=1)

    # Grid over tokens (rows).  Weights/constants use a constant index_map so
    # they stay VMEM-resident across grid steps.
    if tile_n is None:
        tile_n = n if n <= 512 else 512            # tile_n multiple of 8 for big n
    n_pad = pl.cdiv(n, tile_n) * tile_n
    h_in = h if n_pad == n else jnp.pad(h, ((0, n_pad - n), (0, 0)))
    grid = (n_pad // tile_n,)

    def resident(arr):
        return pl.BlockSpec(arr.shape, lambda i: (0, 0))

    out = pl.pallas_call(
        functools.partial(mha_kernel, num_heads=num_heads, head_dim=head_dim),
        out_shape=jax.ShapeDtypeStruct((n_pad, E), jnp.float32),
        grid=grid,
        in_specs=[
            pl.BlockSpec((tile_n, input_dim), lambda i: (i, 0)),   # h
            resident(w_fused), resident(b_fused),
            resident(pool), resident(g), resident(gt), resident(e_head),
            resident(params["wo"]), resident(params["bo"]),
        ],
        out_specs=pl.BlockSpec((tile_n, E), lambda i: (i, 0)),
        compiler_params=pltpu.CompilerParams(dimension_semantics=("parallel",)),
    )(h_in, w_fused, b_fused, pool, g, gt, e_head, params["wo"], params["bo"])
    return out[:n]


def mha_reference(h, params, *, num_heads, head_dim):
    n = h.shape[0]
    q = (h @ params["wq"] + params["bq"]).reshape(n, num_heads, head_dim)
    k = (h @ params["wk"] + params["bk"]).reshape(n, num_heads, head_dim)
    v = (h @ params["wv"] + params["bv"]).reshape(n, num_heads, head_dim)
    scores = jnp.einsum("nqd,nkd->nqk", q, k) / head_dim ** 0.5
    attn = jax.nn.softmax(scores, axis=-1)
    attended = jnp.einsum("nqk,nvd->nqd", attn, v).reshape(n, -1)
    return attended @ params["wo"] + params["bo"]


if __name__ == "__main__":
    N, input_dim, embed_dim, num_heads = 8, 32, 32, 4
    head_dim = embed_dim // num_heads

    key = jax.random.PRNGKey(0)
    keys = jax.random.split(key, 9)
    params = {
        "wq": jax.random.normal(keys[0], (input_dim, embed_dim), jnp.float32) * 0.1,
        "bq": jax.random.normal(keys[1], (1, embed_dim), jnp.float32) * 0.1,
        "wk": jax.random.normal(keys[2], (input_dim, embed_dim), jnp.float32) * 0.1,
        "bk": jax.random.normal(keys[3], (1, embed_dim), jnp.float32) * 0.1,
        "wv": jax.random.normal(keys[4], (input_dim, embed_dim), jnp.float32) * 0.1,
        "bv": jax.random.normal(keys[5], (1, embed_dim), jnp.float32) * 0.1,
        "wo": jax.random.normal(keys[6], (embed_dim, embed_dim), jnp.float32) * 0.1,
        "bo": jax.random.normal(keys[7], (1, embed_dim), jnp.float32) * 0.1,
    }
    h = jax.random.normal(keys[8], (N, input_dim), jnp.float32)

    out = multi_head_attention(h, params, num_heads=num_heads, head_dim=head_dim)
    out = jax.block_until_ready(out)

    ref = mha_reference(h, params, num_heads=num_heads, head_dim=head_dim)
    assert out.shape == (N, embed_dim)
    assert jnp.allclose(out, ref, atol=1e-4, rtol=1e-4), "mismatch vs reference"

    print("KERNEL_OK")
</pallas_src>

<mosaic_0001>
module attributes {stable_mosaic.version = 11 : i64} {
  func.func @mha_kernel(%arg0: i32, %arg1: memref<8x32xf32, #tpu.memory_space<vmem>>, %arg2: memref<32x288xf32, #tpu.memory_space<vmem>>, %arg3: memref<1x288xf32, #tpu.memory_space<vmem>>, %arg4: memref<128x16xf32, #tpu.memory_space<vmem>>, %arg5: memref<16x4xf32, #tpu.memory_space<vmem>>, %arg6: memref<4x16xf32, #tpu.memory_space<vmem>>, %arg7: memref<4x32xf32, #tpu.memory_space<vmem>>, %arg8: memref<32x32xf32, #tpu.memory_space<vmem>>, %arg9: memref<1x32xf32, #tpu.memory_space<vmem>>, %arg10: memref<8x32xf32, #tpu.memory_space<vmem>>) attributes {dimension_semantics = [#tpu.dimension_semantics<parallel>], iteration_bounds = array<i64: 1>, scalar_prefetch = 0 : i64, scratch_operands = 0 : i64, tpu.core_type = #tpu.core_type<tc>, window_params = [{transform_indices = @transform_0, window_bounds = array<i64: 8, 32>}, {pipeline_mode = #tpu.pipeline_mode<synchronous>, transform_indices = @transform_1, window_bounds = array<i64: 32, 288>}, {pipeline_mode = #tpu.pipeline_mode<synchronous>, transform_indices = @transform_2, window_bounds = array<i64: 1, 288>}, {pipeline_mode = #tpu.pipeline_mode<synchronous>, transform_indices = @transform_3, window_bounds = array<i64: 128, 16>}, {pipeline_mode = #tpu.pipeline_mode<synchronous>, transform_indices = @transform_4, window_bounds = array<i64: 16, 4>}, {pipeline_mode = #tpu.pipeline_mode<synchronous>, transform_indices = @transform_5, window_bounds = array<i64: 4, 16>}, {pipeline_mode = #tpu.pipeline_mode<synchronous>, transform_indices = @transform_6, window_bounds = array<i64: 4, 32>}, {pipeline_mode = #tpu.pipeline_mode<synchronous>, transform_indices = @transform_7, window_bounds = array<i64: 32, 32>}, {pipeline_mode = #tpu.pipeline_mode<synchronous>, transform_indices = @transform_8, window_bounds = array<i64: 1, 32>}, {transform_indices = @transform_9, window_bounds = array<i64: 8, 32>}]} {
    %c0 = arith.constant 0 : index
    %c0_0 = arith.constant 0 : index
    %0 = vector.load %arg1[%c0, %c0_0] : memref<8x32xf32, #tpu.memory_space<vmem>>, vector<8x32xf32>
    %c0_1 = arith.constant 0 : index
    %c0_2 = arith.constant 0 : index
    %1 = vector.load %arg2[%c0_1, %c0_2] : memref<32x288xf32, #tpu.memory_space<vmem>>, vector<32x288xf32>
    %cst = arith.constant dense<0.000000e+00> : vector<8x288xf32>
    %2 = tpu.matmul %0, %1, %cst {dimension_numbers = #tpu.dot_dimension_numbers<[1], [0], [0], [1], [0, 0, 1, 1], [], []>} : vector<8x32xf32>, vector<32x288xf32>, vector<8x288xf32> -> vector<8x288xf32>
    %c0_3 = arith.constant 0 : index
    %c0_4 = arith.constant 0 : index
    %3 = vector.load %arg3[%c0_3, %c0_4] : memref<1x288xf32, #tpu.memory_space<vmem>>, vector<1x288xf32>
    %4 = vector.broadcast %3 : vector<1x288xf32> to vector<8x288xf32>
    %5 = arith.addf %2, %4 : vector<8x288xf32>
    %6 = vector.extract_strided_slice %5 {offsets = [0, 0], sizes = [8, 128], strides = [1, 1]} : vector<8x288xf32> to vector<8x128xf32>
    %7 = vector.extract_strided_slice %5 {offsets = [0, 128], sizes = [8, 128], strides = [1, 1]} : vector<8x288xf32> to vector<8x128xf32>
    %8 = vector.extract_strided_slice %5 {offsets = [0, 256], sizes = [8, 32], strides = [1, 1]} : vector<8x288xf32> to vector<8x32xf32>
    %9 = arith.mulf %6, %7 : vector<8x128xf32>
    %c0_5 = arith.constant 0 : index
    %c0_6 = arith.constant 0 : index
    %10 = vector.load %arg4[%c0_5, %c0_6] : memref<128x16xf32, #tpu.memory_space<vmem>>, vector<128x16xf32>
    %cst_7 = arith.constant dense<0.000000e+00> : vector<8x16xf32>
    %11 = tpu.matmul %9, %10, %cst_7 {dimension_numbers = #tpu.dot_dimension_numbers<[1], [0], [0], [1], [0, 0, 1, 1], [], []>} : vector<8x128xf32>, vector<128x16xf32>, vector<8x16xf32> -> vector<8x16xf32>
    %cst_8 = arith.constant dense<0xFF800000> : vector<8xf32>
    %12 = vector.multi_reduction <maximumf>, %11, %cst_8 [1] : vector<8x16xf32> to vector<8xf32>
    %13 = vector.shape_cast %12 : vector<8xf32> to vector<8x1xf32>
    %14 = vector.broadcast %13 : vector<8x1xf32> to vector<8x16xf32>
    %15 = arith.subf %11, %14 : vector<8x16xf32>
    %16 = math.exp %15 : vector<8x16xf32>
    %c0_9 = arith.constant 0 : index
    %c0_10 = arith.constant 0 : index
    %17 = vector.load %arg5[%c0_9, %c0_10] : memref<16x4xf32, #tpu.memory_space<vmem>>, vector<16x4xf32>
    %cst_11 = arith.constant dense<0.000000e+00> : vector<8x4xf32>
    %18 = tpu.matmul %16, %17, %cst_11 {dimension_numbers = #tpu.dot_dimension_numbers<[1], [0], [0], [1], [0, 0, 1, 1], [], []>} : vector<8x16xf32>, vector<16x4xf32>, vector<8x4xf32> -> vector<8x4xf32>
    %19 = tpu.reciprocal %18 : vector<8x4xf32> -> vector<8x4xf32>
    %c0_12 = arith.constant 0 : index
    %c0_13 = arith.constant 0 : index
    %20 = vector.load %arg6[%c0_12, %c0_13] : memref<4x16xf32, #tpu.memory_space<vmem>>, vector<4x16xf32>
    %cst_14 = arith.constant dense<0.000000e+00> : vector<8x16xf32>
    %21 = tpu.matmul %19, %20, %cst_14 {dimension_numbers = #tpu.dot_dimension_numbers<[1], [0], [0], [1], [0, 0, 1, 1], [], []>} : vector<8x4xf32>, vector<4x16xf32>, vector<8x16xf32> -> vector<8x16xf32>
    %22 = arith.mulf %16, %21 : vector<8x16xf32>
    %c0_15 = arith.constant 0 : index
    %c0_16 = arith.constant 0 : index
    %23 = vector.load %arg5[%c0_15, %c0_16] : memref<16x4xf32, #tpu.memory_space<vmem>>, vector<16x4xf32>
    %cst_17 = arith.constant dense<0.000000e+00> : vector<8x4xf32>
    %24 = tpu.matmul %22, %23, %cst_17 {dimension_numbers = #tpu.dot_dimension_numbers<[1], [0], [0], [1], [0, 0, 1, 1], [], []>} : vector<8x16xf32>, vector<16x4xf32>, vector<8x4xf32> -> vector<8x4xf32>
    %c0_18 = arith.constant 0 : index
    %c0_19 = arith.constant 0 : index
    %25 = vector.load %arg7[%c0_18, %c0_19] : memref<4x32xf32, #tpu.memory_space<vmem>>, vector<4x32xf32>
    %cst_20 = arith.constant dense<0.000000e+00> : vector<8x32xf32>
    %26 = tpu.matmul %24, %25, %cst_20 {dimension_numbers = #tpu.dot_dimension_numbers<[1], [0], [0], [1], [0, 0, 1, 1], [], []>} : vector<8x4xf32>, vector<4x32xf32>, vector<8x32xf32> -> vector<8x32xf32>
    %27 = arith.mulf %26, %8 : vector<8x32xf32>
    %c0_21 = arith.constant 0 : index
    %c0_22 = arith.constant 0 : index
    %28 = vector.load %arg8[%c0_21, %c0_22] : memref<32x32xf32, #tpu.memory_space<vmem>>, vector<32x32xf32>
    %cst_23 = arith.constant dense<0.000000e+00> : vector<8x32xf32>
    %29 = tpu.matmul %27, %28, %cst_23 {dimension_numbers = #tpu.dot_dimension_numbers<[1], [0], [0], [1], [0, 0, 1, 1], [], []>} : vector<8x32xf32>, vector<32x32xf32>, vector<8x32xf32> -> vector<8x32xf32>
    %c0_24 = arith.constant 0 : index
    %c0_25 = arith.constant 0 : index
    %30 = vector.load %arg9[%c0_24, %c0_25] : memref<1x32xf32, #tpu.memory_space<vmem>>, vector<1x32xf32>
    %31 = vector.broadcast %30 : vector<1x32xf32> to vector<8x32xf32>
    %32 = arith.addf %29, %31 : vector<8x32xf32>
    %c0_26 = arith.constant 0 : index
    %c0_27 = arith.constant 0 : index
    %33 = vector.load %arg10[%c0_26, %c0_27] : memref<8x32xf32, #tpu.memory_space<vmem>>, vector<8x32xf32>
    tpu.vector_store %arg10[%c0_26, %c0_27], %32 {strides = array<i32>} : memref<8x32xf32, #tpu.memory_space<vmem>>, vector<8x32xf32>,
    return
  }
  func.func @transform_0(%arg0: i32) -> (i32, i32) {
    %c0_i32 = arith.constant 0 : i32
    %c0_i32_0 = arith.constant 0 : i32
    return %arg0, %c0_i32 : i32, i32
  }
  func.func @transform_1(%arg0: i32) -> (i32, i32) {
    %c0_i32 = arith.constant 0 : i32
    %c0_i32_0 = arith.constant 0 : i32
    %c0_i32_1 = arith.constant 0 : i32
    return %c0_i32, %c0_i32_0 : i32, i32
  }
  func.func @transform_2(%arg0: i32) -> (i32, i32) {
    %c0_i32 = arith.constant 0 : i32
    %c0_i32_0 = arith.constant 0 : i32
    %c0_i32_1 = arith.constant 0 : i32
    return %c0_i32, %c0_i32_0 : i32, i32
  }
  func.func @transform_3(%arg0: i32) -> (i32, i32) {
    %c0_i32 = arith.constant 0 : i32
    %c0_i32_0 = arith.constant 0 : i32
    %c0_i32_1 = arith.constant 0 : i32
    return %c0_i32, %c0_i32_0 : i32, i32
  }
  func.func @transform_4(%arg0: i32) -> (i32, i32) {
    %c0_i32 = arith.constant 0 : i32
    %c0_i32_0 = arith.constant 0 : i32
    %c0_i32_1 = arith.constant 0 : i32
    return %c0_i32, %c0_i32_0 : i32, i32
  }
  func.func @transform_5(%arg0: i32) -> (i32, i32) {
    %c0_i32 = arith.constant 0 : i32
    %c0_i32_0 = arith.constant 0 : i32
    %c0_i32_1 = arith.constant 0 : i32
    return %c0_i32, %c0_i32_0 : i32, i32
  }
  func.func @transform_6(%arg0: i32) -> (i32, i32) {
    %c0_i32 = arith.constant 0 : i32
    %c0_i32_0 = arith.constant 0 : i32
    %c0_i32_1 = arith.constant 0 : i32
    return %c0_i32, %c0_i32_0 : i32, i32
  }
  func.func @transform_7(%arg0: i32) -> (i32, i32) {
    %c0_i32 = arith.constant 0 : i32
    %c0_i32_0 = arith.constant 0 : i32
    %c0_i32_1 = arith.constant 0 : i32
    return %c0_i32, %c0_i32_0 : i32, i32
  }
  func.func @transform_8(%arg0: i32) -> (i32, i32) {
    %c0_i32 = arith.constant 0 : i32
    %c0_i32_0 = arith.constant 0 : i32
    %c0_i32_1 = arith.constant 0 : i32
    return %c0_i32, %c0_i32_0 : i32, i32
  }
  func.func @transform_9(%arg0: i32) -> (i32, i32) {
    %c0_i32 = arith.constant 0 : i32
    %c0_i32_0 = arith.constant 0 : i32
    return %arg0, %c0_i32 : i32, i32
  }
}

</mosaic_0001>

<bundles_post_ra>
// kernel: tpu_custom_call.1
= control target key start
LH: loop header
LB: loop body
LE: loop exit
PB: predicated region body
PF: predicated region fallthrough
CT: control target
= control target key end

     0   :  { %v918_v7 = vmov 0.0   ;;  %v919_v8 = vmov 0.0|0.0   ;;  %vm63_vm0 = vcmask 261120   ;;  %s1157_s0 = inlined_call_operand.vmem [shape: f32[8,32], index: 0, kind: input, shape index: {}]   ;;  %s1158_s1 = inlined_call_operand.vmem [shape: f32[32,288], index: 1, kind: input, shape index: {}]   ;;  %s1159_s2 = inlined_call_operand.vmem [shape: f32[1,288], index: 2, kind: input, shape index: {}]   ;;  %s1160_s3 = inlined_call_operand.vmem [shape: f32[128,16], index: 3, kind: input, shape index: {}]   ;;  %s1161_s4 = inlined_call_operand.vmem [shape: f32[16,4], index: 4, kind: input, shape index: {}]   ;;  %s1162_s5 = inlined_call_operand.vmem [shape: f32[4,16], index: 5, kind: input, shape index: {}]   ;;  %s1163_s6 = inlined_call_operand.vmem [shape: f32[4,32], index: 6, kind: input, shape index: {}]   ;;  %s1164_s7 = inlined_call_operand.vmem [shape: f32[32,32], index: 7, kind: input, shape index: {}]   ;;  %s1165_s8 = inlined_call_operand.vmem [shape: f32[1,32], index: 8, kind: input, shape index: {}]   ;;  %s1166_s9 = inlined_call_operand.hbm [shape: f32[8,32], index: 9, kind: output, shape index: {}]  }
   0x1   :  { %v35_v0 = vld [vmem:[%s1158_s1 + $0x8] sm:$0xff]  ;;  %v38_v1 = vld [vmem:[%s1158_s1 + $0x20] sm:$0xff]  ;;  %v37_v4 = vld [vmem:[%s1158_s1 + $0x18] sm:$0xff]  ;;  %131 = vmatprep.mubr.f32.mxu0 %v918_v7  ;;  %844 = vmatprep.subr.bf16.mxu1 %v919_v8 }
   0x2   :  { %v34_v2 = vld [vmem:[%s1158_s1] sm:$0xff]  ;;  %v836_v3 = vpack.c.bf16 %v38_v1, %v35_v0  ;;  %v41_v5 = vld [vmem:[%s1158_s1 + $0x38] sm:$0xff]  ;;  %v44_v6 = vld [vmem:[%s1158_s1 + $0x50] sm:$0xff] }
   0x3   :  { %v838_v9 = vpack.c.bf16 %v37_v4, %v34_v2  ;;  %v840_v10 = vpack.c.bf16 %v44_v6, %v41_v5  ;;  %v40_v11 = vld [vmem:[%s1158_s1 + $0x30] sm:$0xff]  ;;  %v43_v12 = vld [vmem:[%s1158_s1 + $0x48] sm:$0xff]  ;;  %v209_v14 = vld [vmem:[%s1160_s3] sm:$0xff] }
   0x4   :  { %837 = vmatprep.subr.bf16.mxu0 %v836_v3  ;;  %v842_v13 = vpack.c.bf16 %v43_v12, %v40_v11  ;;  %v210_v15 = vld [vmem:[%s1160_s3 + $0x8] sm:$0xff]  ;;  %v1007_v16 = vld [vmem:[%s1157_s0] sm:$0xff] }
   0x5   :  { %839 = vmatpush1.bf16.msra.mxu0 %v838_v9  ;;  %v851_v17 = vpack.c.bf16 %v210_v15, %v209_v14 }
   0x6   :  { %841 = vmatprep.subr.bf16.mxu0 %v840_v10 }
   0x9   :  { %843 = vmatpush1.bf16.msra.mxu0 %v842_v13 }
   0xa   :  { %14 = vsyncpa [#allocation3], 0  ;;  %850 = vmatprep.subr.bf16.mxu0 %v919_v8  ;;  %v211_v18 = vld [vmem:[%s1160_s3 + $0x10] sm:$0xff]  ;;  %v212_v19 = vld [vmem:[%s1160_s3 + $0x18] sm:$0xff]  ;;  %vm920_vm1 = vmmov 0   ;;  %v48_v39 = vlaneseq  ;;  %vm295_vm2 = vcmask 130048  }
   0xb   :  { %v854_v20 = vpack.c.bf16 %v212_v19, %v211_v18  ;;  %v213_v21 = vld [vmem:[%s1160_s3 + $0x20] sm:$0xff]  ;;  %v214_v22 = vld [vmem:[%s1160_s3 + $0x28] sm:$0xff]  ;;  %v215_v24 = vld [vmem:[%s1160_s3 + $0x30] sm:$0xff]  ;;  %763 = vmatprep.mubr.msk.f32.mxu1 %vm920_vm1, %v918_v7  ;;  %vm383_vm3 = vcmask 1043456   ;;  %vm379_vm4 = vcmask 31744   ;;  %s921_s15 = smov [#allocation2]  }
   0xc   :  { %708 = vmatmul.mubr.msk.f32.vlgmr.msra.gmra.mrb[0].mxu0 %vm63_vm0, %v1007_v16  ;;  %v857_v23 = vpack.c.bf16 %v214_v22, %v213_v21  ;;  %v216_v25 = vld [vmem:[%s1160_s3 + $0x38] sm:$0xff]  ;;  %v217_v27 = vld [vmem:[%s1160_s3 + $0x40] sm:$0xff]  ;;  %v218_v28 = vld [vmem:[%s1160_s3 + $0x48] sm:$0xff]  ;;  %v1065_v40 = vshrl.u32 %v48_v39, 7  ;;  %s700_s16 = sshll.u32 %s921_s15, 4  ;;  %s701_s16 = int_to_ptr.vmem [resolvable:$true] %s700_s16 }
   0xd   :  { %852 = vmatpush3.bf16.msra.mxu0 %v851_v17  ;;  %v860_v26 = vpack.c.bf16 %v216_v25, %v215_v24  ;;  %v863_v29 = vpack.c.bf16 %v218_v28, %v217_v27  ;;  %v219_v30 = vld [vmem:[%s1160_s3 + $0x50] sm:$0xff]  ;;  %v220_v31 = vld [vmem:[%s1160_s3 + $0x58] sm:$0xff]  ;;  %v221_v33 = vld [vmem:[%s1160_s3 + $0x60] sm:$0xff]  ;;  %798 = vmatprep.mubr.msk.f32.mxu0 %vm920_vm1, %v918_v7  ;;  %p899_p1 = scmp.lt.s32.totalorder %s701_s16, %s701_s16 }
   0xe   :  { %853 = vmatprep.subr.bf16.mxu0 %v919_v8  ;;  %v866_v32 = vpack.c.bf16 %v220_v31, %v219_v30  ;;  %v222_v34 = vld [vmem:[%s1160_s3 + $0x68] sm:$0xff]  ;;  %v223_v36 = vld [vmem:[%s1160_s3 + $0x70] sm:$0xff]  ;;  %v224_v37 = vld [vmem:[%s1160_s3 + $0x78] sm:$0xff]  ;;  %v50_v41 = vsub.s32 0, %v1065_v40  ;;  %v54_v43 = vsub.s32 1, %v1065_v40 }
   0xf   :  { %v869_v35 = vpack.c.bf16 %v222_v34, %v221_v33  ;;  %v872_v38 = vpack.c.bf16 %v224_v37, %v223_v36  ;;  %v1071_v42 = vld [vmem:[%s1159_s2] sm:$0x7]  ;;  %v36_v54 = vld [vmem:[%s1158_s1 + $0x10] sm:$0xff]  ;;  %v39_v55 = vld [vmem:[%s1158_s1 + $0x28] sm:$0xff] }
  0x10   :  { %v51_v44 = vrot.slane %v1071_v42, %v50_v41  ;;  %v55_v45 = vrot.slane %v1071_v42, %v54_v43  ;;  %v845_v56 = vpack.c.bf16 %v39_v55, %v36_v54  ;;  %v42_v57 = vld [vmem:[%s1158_s1 + $0x40] sm:$0xff]  ;;  %v45_v58 = vld [vmem:[%s1158_s1 + $0x58] sm:$0xff]  ;;  %v303_v61 = vld [vmem:[%s1161_s4 + $0x8] sm:$0xff] }
  0x11   :  { %855 = vmatpush3.bf16.msra.mxu0 %v854_v20  ;;  %v302_v59 = vld [vmem:[%s1161_s4] sm:$0xff]  ;;  %v848_v60 = vpack.c.bf16 %v45_v58, %v42_v57  ;;  %v611_v20 = vld [vmem:[%s1164_s7 + $0x10] sm:$0xff]  ;;  %v612_v21 = vld [vmem:[%s1164_s7 + $0x18] sm:$0xff] }
  0x12   :  { %856 = vmatprep.subr.bf16.mxu0 %v919_v8  ;;  %846 = vmatpush3.bf16.msra.mxu1 %v845_v56  ;;  %v875_v62 = vpack.c.bf16 %v303_v61, %v302_v59  ;;  %v378_v5 = vld [vmem:[%s1162_s5] sm:$0xf]  ;;  %v884_v22 = vpack.c.bf16 %v612_v21, %v611_v20 }
  0x13   :  { %847 = vmatprep.subr.bf16.mxu1 %v919_v8  ;;  %v531_v14 = vld [vmem:[%s1163_s6] sm:$0xf] }
  0x14   :  { %v609_v15 = vld [vmem:[%s1164_s7] sm:$0xff] }
  0x15   :  { %858 = vmatpush3.bf16.msra.mxu0 %v857_v23  ;;  %v58_v23 = vsub.s32 2, %v1065_v40 }
  0x16   :  { %859 = vmatprep.subr.bf16.mxu0 %v919_v8  ;;  %849 = vmatpush3.bf16.msra.mxu1 %v848_v60 }
  0x17   :  { %874 = vmatprep.subr.bf16.mxu1 %v919_v8  ;;  %v59_v24 = vrot.slane %v1071_v42, %v58_v23 }
  0x19   :  { %861 = vmatpush3.bf16.msra.mxu0 %v860_v26  ;;  %764 = vmatmul.mubr.msk.f32.vlgmr.msra.gmra.mrb[0].mxu1 %vm63_vm0, %v1007_v16  ;;  %v610_v16 = vld [vmem:[%s1164_s7 + $0x8] sm:$0xff]  ;;  %s894_s7 = scalar_lea.vmem %s701_s16, 128 }
  0x1a   :  { %862 = vmatprep.subr.bf16.mxu0 %v919_v8  ;;  %876 = vmatpush3.bf16.msra.mxu1 %v875_v62  ;;  %v881_v17 = vpack.c.bf16 %v610_v16, %v609_v15  ;;  %p895_p0 = scmp.ne.s32.totalorder %s701_s16, %s894_s7  ;;  %p900_p2 = scmp.lt.s32.totalorder %s894_s7, %s894_s7 }
  0x1b   :  { %805 = vmatprep.mubr.msk.f32.mxu1 %vm920_vm1, %v918_v7  ;;  %808 = vmatprep.subr.mxu1 %v918_v7 }
  0x1c   :  { %p901_p3 = por %p900_p2, %p899_p1 }
  0x1d   :  { %864 = vmatpush3.bf16.msra.mxu0 %v863_v29 }
  0x1e   :  { %865 = vmatprep.subr.bf16.mxu0 %v919_v8  ;;  %p902_p4 = pnand %p901_p3, %p895_p0 }
  0x21   :  { %867 = vmatpush3.bf16.msra.mxu0 %v866_v32 }
  0x22   :  { %868 = vmatprep.subr.bf16.mxu0 %v919_v8 }
  0x25   :  { %870 = vmatpush3.bf16.msra.mxu0 %v869_v35 }
  0x26   :  { %871 = vmatprep.subr.bf16.mxu0 %v919_v8 }
  0x29   :  { %873 = vmatpush3.bf16.msra.mxu0 %v872_v38 }
  0xdf   :  { %v133_v46 = vpop.f32.mrb[0].mxu0 }
  0xe0   :  { %v134_v47 = vadd.f32 %v133_v46, %v51_v44  ;;  %v135_v48 = vpop.f32.mrb[1].mxu0 }
  0xe1   :  { %v136_v49 = vadd.f32 %v135_v48, %v55_v45 }
  0xe3   :  { %v208_v50 = vmul.f32 %v136_v49, %v134_v47 }
  0xe5   :  { %799 = vmatmul.mubr.f32.vlgmr.msra.gmra.mrb[2].mxu0 %v208_v50 }
  0xec   :  { %v204_v3 = vpop.f32.mrb[0].mxu1 }
  0xed   :  { %v765_v4 = vpop.f32.mrb[1].mxu1  ;;  %v205_v25 = vadd.f32 %v204_v3, %v59_v24 }
 0x1b8   :  { %v291_v51 = vpop.f32.mrb[2].mxu0 }
 0x1b9   :  { %v800_v52 = vpop.f32.mrb[3].mxu0  ;;  %v296_v53 = vsel %vm295_vm2, %v291_v51, -inf }
 0x1ba   :  { %297 = vmax.xlane.f32.xlu0 %v296_v53 }
 0x247   :  { %v298_v63 = vpop.xlane.xlu0 %297 }
 0x248   :  { %v299_v0 = vsub.f32 %v291_v51, %v298_v63 }
 0x24a   :  { %v300_v1 = vmul.f32 1.442695, %v299_v0 }
 0x24c   :  { %890 = vpow2.f32 %v300_v1 }
 0x256   :  { %v891_v2 = vpop.eup %890 }
 0x257   :  { %806 = vmatmul.mubr.msk.f32.vlgmr.msra.gmra.mrb[2].mxu1 %vm295_vm2, %v891_v2 }
 0x258   :  { %810 = vmatprep.mubr.msk.f32.mxu1 %vm920_vm1, %v918_v7  ;;  %809 = vmatpush3.msk.msra.mxu1 %vm383_vm3, %v378_v5 }
 0x259   :  { %877 = vmatprep.subr.bf16.mxu1 %v919_v8 }
 0x32a   :  { %v373_v6 = vpop.f32.mrb[2].mxu1 }
 0x32b   :  { %892 = vrcp.f32 %v373_v6  ;;  %v807_v9 = vpop.f32.mrb[3].mxu1 }
 0x335   :  { %v893_v10 = vpop.eup %892 }
 0x336   :  { %811 = vmatmul.mubr.msk.f32.vlgmr.msra.gmra.mrb[4].mxu1 %vm379_vm4, %v893_v10 }
 0x337   :  { %879 = vmatpush3.bf16.msra.mxu1 %v875_v62  ;;  %817 = vmatprep.mubr.msk.f32.mxu1 %vm920_vm1, %v918_v7 }
 0x338   :  { %820 = vmatprep.subr.mxu1 %v918_v7 }
 0x409   :  { %v453_v11 = vpop.f32.mrb[4].mxu1 }
 0x40a   :  { %v457_v12 = vmul.f32 %v891_v2, %v453_v11  ;;  %v812_v13 = vpop.f32.mrb[5].mxu1 }
 0x40c   :  { %818 = vmatmul.mubr.msk.f32.vlgmr.msra.gmra.mrb[6].mxu1 %vm295_vm2, %v457_v12 }
 0x40d   :  { %821 = vmatpush3.msk.msra.mxu1 %vm383_vm3, %v531_v14  ;;  %822 = vmatprep.mubr.msk.f32.mxu1 %vm920_vm1, %v918_v7 }
 0x40e   :  { %880 = vmatprep.subr.bf16.mxu1 %v919_v8 }
 0x4df   :  { %v527_v18 = vpop.f32.mrb[6].mxu1 }
 0x4e0   :  { %v819_v19 = vpop.f32.mrb[7].mxu1  ;;  %823 = vmatmul.mubr.msk.f32.vlgmr.msra.gmra.mrb[8].mxu1 %vm379_vm4, %v527_v18 }
 0x4e1   :  { %882 = vmatpush3.bf16.msra.mxu1 %v881_v17  ;;  %833 = vmatprep.mubr.msk.f32.mxu1 %vm920_vm1, %v918_v7 }
 0x4e2   :  { %883 = vmatprep.subr.bf16.mxu1 %v919_v8  ;;  %v716_v8 = vld [vmem:[%s1165_s8] ss:$0 sm:$0xff] }
 0x4e5   :  { %885 = vmatpush3.bf16.msra.mxu1 %v884_v22 }
 0x5b3   :  { %v604_v26 = vpop.f32.mrb[8].mxu1 }
 0x5b4   :  { %v608_v27 = vmul.f32 %v604_v26, %v205_v25  ;;  %v824_v7 = vpop.f32.mrb[9].mxu1 }
 0x5b6   :  { %834 = vmatmul.mubr.msk.f32.vlgmr.msra.gmra.mrb[10].mxu1 %vm63_vm0, %v608_v27 }
 0x689   :  { %v689_v28 = vpop.f32.mrb[10].mxu1 }
 0x68a   :  { %v690_v29 = vadd.f32 %v716_v8, %v689_v28  ;;  %v835_v30 = vpop.f32.mrb[11].mxu1 }
 0x68c   :  { %693 = vst.msk [vmem:[#allocation2] sm:$0xff] %vm63_vm0, %v690_v29 }
 0x68d   :  { %905 = shalt.err (!%p902_p4)
}
 0x68e   :  { %s906_s17 = scalar_lea.hbm %s1166_s9, 128 }
 0x68f   :  { %p907_p5 = scmp.ne.s32.totalorder %s1166_s9, %s906_s17  ;;  %p910_p6 = scmp.lt.u32.totalorder %s906_s17, %s1166_s9 }
 0x691   :  { %p912_p7 = pnand %p910_p6, %p907_p5 }
 0x693   :  { %915 = shalt.err (!%p912_p7)
}
 0x694   :  { %703 = dma.vmem_to_hbm [thread:$0]  %s701_s16, 128, %s1166_s9, [#allocation3]  }
 0x695   :  { %916 = dma.done.wait [#allocation3], 128  }
 0x696   :  { %917 = vsyncadd [#allocation3], 4294967168 }
 0x697   :  { %707 = vsyncpa [#allocation3], 1 }

</bundles_post_ra>
